<compile_context>
chip_gen: v7x
topology: tpu7x:2x2x1
jax: 0.10.0
libtpu: 0.0.40
codegen_flags: <defaults>
</compile_context>

<pallas_src>
import functools

import jax
import jax.numpy as jnp
from jax.experimental import pallas as pl
from jax.experimental.pallas import tpu as pltpu

LEAKY_SLOPE = 0.01  # nn.LeakyReLU() default negative_slope


def _layer_dims(src, dst, delta=0.4, middle=1.2):
    """Replicates the width schedule from HiddenLayers.__init__."""
    n = src
    mid = int((src if src > dst else dst) * middle)
    flag_descent = False
    dims = []  # list of (in, out); LeakyReLU follows every layer except the last
    while True:
        if not flag_descent:
            next_n = int(n * (1 + delta))
            dims.append((n, next_n))
            n = next_n
            if n > mid:
                flag_descent = True
        else:
            next_n = int(n * (1 - delta))
            if next_n > dst:
                dims.append((n, next_n))
                n = next_n
            else:
                dims.append((n, dst))
                break
    return dims


def _round_up(x, m):
    return ((x + m - 1) // m) * m


def _init_h(h_ref, x_ref, src, pad_w):
    """Zero the padded bf16 activation scratch and drop x into the first src lanes."""
    x_b = x_ref[...].astype(h_ref.dtype)
    if src == pad_w:
        h_ref[...] = x_b
    else:
        h_ref[...] = jnp.zeros(h_ref.shape, h_ref.dtype)
        h_ref[:, :src] = x_b


def _mlp_resident_kernel(x_ref, w_ref, b_ref, o_ref, h_ref, *,
                         src, pad_w, out_w, num_layers):
    """Whole weight stack resident in VMEM; full forward in one grid step per tile."""
    _init_h(h_ref, x_ref, src, pad_w)
    # Hidden layers: Linear + LeakyReLU. bf16 MXU operands, f32 accumulation.
    for l in range(num_layers - 1):
        acc = jnp.dot(h_ref[...], w_ref[l], preferred_element_type=jnp.float32)
        acc = acc + b_ref[l]
        h_ref[...] = jnp.maximum(acc, LEAKY_SLOPE * acc).astype(h_ref.dtype)
    # Final Linear (no activation); lane-trimmed, f32 output.
    acc = jnp.dot(h_ref[...], w_ref[num_layers - 1], preferred_element_type=jnp.float32)
    acc = acc + b_ref[num_layers - 1]
    o_ref[...] = acc[:, :out_w].astype(o_ref.dtype)


def _mlp_stream_kernel(x_ref, w_ref, b_ref, o_ref, h_ref, *, src, pad_w, out_w):
    """Fallback: one weight tile streamed per grid step (layer axis 'arbitrary')."""
    l = pl.program_id(1)
    last = pl.num_programs(1) - 1

    @pl.when(l == 0)
    def _init():
        _init_h(h_ref, x_ref, src, pad_w)

    acc = jnp.dot(h_ref[...], w_ref[0], preferred_element_type=jnp.float32)
    acc = acc + b_ref[0]

    @pl.when(l < last)
    def _hidden():
        h_ref[...] = jnp.maximum(acc, LEAKY_SLOPE * acc).astype(h_ref.dtype)

    @pl.when(l == last)
    def _final():
        o_ref[...] = acc[:, :out_w].astype(o_ref.dtype)


def _physical_vmem_bytes():
    try:
        info = pltpu.get_tpu_info()
        cap = getattr(info, "vmem_capacity_bytes", None)
        if cap:
            return int(cap)
    except Exception:
        pass
    return 64 * 1024 * 1024  # conservative fallback: v7x per-TensorCore VMEM


def hidden_layers_forward(x, w_stack, b_stack, dst, force_stream=False):
    """x: [batch, src] float32. Returns [batch, dst] float32."""
    batch, src = x.shape
    num_layers, pad_w, _ = w_stack.shape
    out_w = min(_round_up(max(dst, 1), 128), pad_w)
    w_bytes = int(w_stack.dtype.itemsize)

    phys_vmem = _physical_vmem_bytes()
    vmem_cap = min(int(0.75 * phys_vmem), 96 * 1024 * 1024)      # 48 MiB on v7x
    resid_budget = min(40 * 1024 * 1024, int(0.6 * phys_vmem))   # v7x-safe residency gate

    # Can the (double-buffered) weight stack live in VMEM for the whole call?
    stack_bytes = 2 * num_layers * pad_w * pad_w * w_bytes + 2 * num_layers * pad_w * 4
    resident = (not force_stream) and stack_bytes <= resid_budget

    # Batch tile: multiple of 8 sublanes; larger when streaming (weight reuse ~ bt
    # FLOP/byte); guarantee >= 2 tiles when batch allows so v7x megacore gets fed.
    if batch <= 256:
        bt = max(8, _round_up(batch, 8))
    else:
        bt = 256 if resident else 512
    if batch >= 16:
        while bt > 8 and (batch + bt - 1) // bt < 2:
            bt = max(8, _round_up(bt // 2, 8))

    pad_b = _round_up(batch, bt)
    if pad_b != batch:
        x = jnp.pad(x, ((0, pad_b - batch), (0, 0)))
    n_btiles = pad_b // bt

    if resident:
        grid = (n_btiles,)
        kernel = functools.partial(_mlp_resident_kernel, src=src, pad_w=pad_w,
                                   out_w=out_w, num_layers=num_layers)
        in_specs = [
            pl.BlockSpec((bt, src), lambda i: (i, 0)),                      # x
            pl.BlockSpec((num_layers, pad_w, pad_w), lambda i: (0, 0, 0)),  # all weights
            pl.BlockSpec((num_layers, 1, pad_w), lambda i: (0, 0, 0)),      # all biases
        ]
        out_specs = pl.BlockSpec((bt, out_w), lambda i: (i, 0))
        dim_sem = ("parallel",)
        weight_reads = 1
        w_buf = 2 * num_layers * pad_w * pad_w * w_bytes
        b_buf = 2 * num_layers * pad_w * 4
    else:
        grid = (n_btiles, num_layers)
        kernel = functools.partial(_mlp_stream_kernel, src=src, pad_w=pad_w, out_w=out_w)
        in_specs = [
            pl.BlockSpec((bt, src), lambda i, l: (i, 0)),            # x
            pl.BlockSpec((1, pad_w, pad_w), lambda i, l: (l, 0, 0)),  # per-layer weight
            pl.BlockSpec((1, 1, pad_w), lambda i, l: (l, 0, 0)),      # per-layer bias
        ]
        out_specs = pl.BlockSpec((bt, out_w), lambda i, l: (i, 0))
        dim_sem = ("parallel", "arbitrary")
        weight_reads = n_btiles
        w_buf = 2 * pad_w * pad_w * w_bytes
        b_buf = 2 * pad_w * 4

    vmem_need = (
        w_buf + b_buf
        + 2 * bt * src * 4      # x double buffer
        + 2 * bt * out_w * 4    # out double buffer
        + bt * pad_w * 2        # bf16 activation scratch
    )
    vmem_limit = min(max(2 * vmem_need, 16 * 1024 * 1024), vmem_cap)

    cost = pl.CostEstimate(
        flops=2 * num_layers * pad_b * pad_w * pad_w,
        transcendentals=0,
        bytes_accessed=(
            weight_reads * num_layers * pad_w * pad_w * w_bytes   # weights (per HBM read)
            + weight_reads * num_layers * pad_w * 4               # biases
            + pad_b * src * 4                                     # x
            + pad_b * out_w * 4                                   # output (lane-trimmed)
        ),
    )

    out_pad = pl.pallas_call(
        kernel,
        out_shape=jax.ShapeDtypeStruct((pad_b, out_w), jnp.float32),
        grid_spec=pltpu.PrefetchScalarGridSpec(
            num_scalar_prefetch=0,
            grid=grid,
            in_specs=in_specs,
            out_specs=out_specs,
            scratch_shapes=[pltpu.VMEM((bt, pad_w), jnp.bfloat16)],
        ),
        compiler_params=pltpu.CompilerParams(
            dimension_semantics=dim_sem,
            vmem_limit_bytes=vmem_limit,
        ),
        cost_estimate=cost,
    )(x, w_stack, b_stack)

    return out_pad[:batch, :dst]


def init_params(key, dims, pad_w):
    """W ~ N(0, 0.01) (nn.init.normal_), bias ~ U(-1/sqrt(in), 1/sqrt(in)).

    Weights are stored already-transposed [in, out], zero-padded to [pad_w, pad_w]
    and cast to bf16 for the MXU; biases stay f32. Raw f32 params kept for the
    reference path.
    """
    num_layers = len(dims)
    w_stack = jnp.zeros((num_layers, pad_w, pad_w), jnp.float32)
    b_stack = jnp.zeros((num_layers, 1, pad_w), jnp.float32)
    raw = []
    for l, (n_in, n_out) in enumerate(dims):
        key, kw, kb = jax.random.split(key, 3)
        w = 0.01 * jax.random.normal(kw, (n_in, n_out), jnp.float32)
        bound = 1.0 / (n_in ** 0.5)
        b = jax.random.uniform(kb, (n_out,), jnp.float32, minval=-bound, maxval=bound)
        w_stack = w_stack.at[l, :n_in, :n_out].set(w)
        b_stack = b_stack.at[l, 0, :n_out].set(b)
        raw.append((w, b))
    return w_stack.astype(jnp.bfloat16), b_stack, raw


def reference_forward(x, raw_params):
    h = x
    for l, (w, b) in enumerate(raw_params):
        h = h @ w + b
        if l < len(raw_params) - 1:
            h = jnp.maximum(h, LEAKY_SLOPE * h)
    return h


if __name__ == "__main__":
    src, dst = 32, 8
    dims = _layer_dims(src, dst)  # [(32,44),(44,26),(26,15),(15,9),(9,8)]
    max_w = max(max(a, b) for a, b in dims + [(src, dst)])
    pad_w = _round_up(max_w, 128)  # 128 for this config

    key = jax.random.PRNGKey(0)
    key, kx = jax.random.split(key)
    batch = 8
    x = jax.random.normal(kx, (batch, src), jnp.float32)

    w_stack, b_stack, raw = init_params(key, dims, pad_w)
    ref = reference_forward(x, raw)

    # Primary (resident-weight) path: whole forward in one grid step per batch tile.
    fwd = jax.jit(functools.partial(hidden_layers_forward, dst=dst))
    out = jax.block_until_ready(fwd(x, w_stack, b_stack))
    assert out.shape == (batch, dst), out.shape
    # bf16 matmul operands w/ f32 accumulation -> small drift vs pure-f32 reference.
    assert jnp.allclose(out, ref, atol=1e-2, rtol=1e-2), float(jnp.max(jnp.abs(out - ref)))

    # Streaming fallback path (used when the weight stack exceeds the VMEM budget).
    fwd_stream = jax.jit(
        functools.partial(hidden_layers_forward, dst=dst, force_stream=True))
    out_s = jax.block_until_ready(fwd_stream(x, w_stack, b_stack))
    assert out_s.shape == (batch, dst), out_s.shape
    assert jnp.allclose(out_s, ref, atol=1e-2, rtol=1e-2), float(jnp.max(jnp.abs(out_s - ref)))

    print("KERNEL_OK")
</pallas_src>

<mosaic_0001>
module attributes {stable_mosaic.version = 11 : i64} {
  func.func @_mlp_resident_kernel(%arg0: i32, %arg1: memref<8x32xf32, #tpu.memory_space<vmem>>, %arg2: memref<5x128x128xbf16, #tpu.memory_space<vmem>>, %arg3: memref<5x1x128xf32, #tpu.memory_space<vmem>>, %arg4: memref<8x128xf32, #tpu.memory_space<vmem>>, %arg5: memref<8x128xbf16, #tpu.memory_space<vmem>>) attributes {dimension_semantics = [#tpu.dimension_semantics<parallel>], iteration_bounds = array<i64: 1>, scalar_prefetch = 0 : i64, scratch_operands = 1 : i64, tpu.core_type = #tpu.core_type<tc>, window_params = [{transform_indices = @transform_0, window_bounds = array<i64: 8, 32>}, {pipeline_mode = #tpu.pipeline_mode<synchronous>, transform_indices = @transform_1, window_bounds = array<i64: 5, 128, 128>}, {pipeline_mode = #tpu.pipeline_mode<synchronous>, transform_indices = @transform_2, window_bounds = array<i64: 5, 1, 128>}, {transform_indices = @transform_3, window_bounds = array<i64: 8, 128>}]} {
    %c0 = arith.constant 0 : index
    %c0_0 = arith.constant 0 : index
    %0 = vector.load %arg1[%c0, %c0_0] : memref<8x32xf32, #tpu.memory_space<vmem>>, vector<8x32xf32>
    %1 = arith.truncf %0 : vector<8x32xf32> to vector<8x32xbf16>
    %cst = arith.constant 0.000000e+00 : bf16
    %2 = vector.broadcast %cst : bf16 to vector<8x128xbf16>
    %c0_1 = arith.constant 0 : index
    %c0_2 = arith.constant 0 : index
    %3 = vector.load %arg5[%c0_1, %c0_2] : memref<8x128xbf16, #tpu.memory_space<vmem>>, vector<8x128xbf16>
    tpu.vector_store %arg5[%c0_1, %c0_2], %2 {strides = array<i32>} : memref<8x128xbf16, #tpu.memory_space<vmem>>, vector<8x128xbf16>,
    %c0_3 = arith.constant 0 : index
    %c0_4 = arith.constant 0 : index
    %4 = vector.load %arg5[%c0_3, %c0_4] : memref<8x128xbf16, #tpu.memory_space<vmem>>, vector<8x32xbf16>
    tpu.vector_store %arg5[%c0_3, %c0_4], %1 {strides = array<i32>} : memref<8x128xbf16, #tpu.memory_space<vmem>>, vector<8x32xbf16>,
    %c0_5 = arith.constant 0 : index
    %c0_6 = arith.constant 0 : index
    %5 = vector.load %arg5[%c0_5, %c0_6] : memref<8x128xbf16, #tpu.memory_space<vmem>>, vector<8x128xbf16>
    %c0_7 = arith.constant 0 : index
    %c0_8 = arith.constant 0 : index
    %c0_9 = arith.constant 0 : index
    %6 = vector.load %arg2[%c0_7, %c0_8, %c0_9] : memref<5x128x128xbf16, #tpu.memory_space<vmem>>, vector<1x128x128xbf16>
    %7 = vector.shape_cast %6 : vector<1x128x128xbf16> to vector<128x128xbf16>
    %cst_10 = arith.constant dense<0.000000e+00> : vector<8x128xf32>
    %8 = tpu.matmul %5, %7, %cst_10 {dimension_numbers = #tpu.dot_dimension_numbers<[1], [0], [0], [1], [0, 0, 1, 1], [], []>} : vector<8x128xbf16>, vector<128x128xbf16>, vector<8x128xf32> -> vector<8x128xf32>
    %c0_11 = arith.constant 0 : index
    %c0_12 = arith.constant 0 : index
    %c0_13 = arith.constant 0 : index
    %9 = vector.load %arg3[%c0_11, %c0_12, %c0_13] : memref<5x1x128xf32, #tpu.memory_space<vmem>>, vector<1x1x128xf32>
    %10 = vector.shape_cast %9 : vector<1x1x128xf32> to vector<1x128xf32>
    %11 = vector.broadcast %10 : vector<1x128xf32> to vector<8x128xf32>
    %12 = arith.addf %8, %11 : vector<8x128xf32>
    %cst_14 = arith.constant 0.00999999977 : f32
    %13 = vector.broadcast %cst_14 : f32 to vector<8x128xf32>
    %14 = arith.mulf %13, %12 : vector<8x128xf32>
    %15 = arith.maximumf %12, %14 : vector<8x128xf32>
    %16 = arith.truncf %15 : vector<8x128xf32> to vector<8x128xbf16>
    %c0_15 = arith.constant 0 : index
    %c0_16 = arith.constant 0 : index
    %17 = vector.load %arg5[%c0_15, %c0_16] : memref<8x128xbf16, #tpu.memory_space<vmem>>, vector<8x128xbf16>
    tpu.vector_store %arg5[%c0_15, %c0_16], %16 {strides = array<i32>} : memref<8x128xbf16, #tpu.memory_space<vmem>>, vector<8x128xbf16>,
    %c0_17 = arith.constant 0 : index
    %c0_18 = arith.constant 0 : index
    %18 = vector.load %arg5[%c0_17, %c0_18] : memref<8x128xbf16, #tpu.memory_space<vmem>>, vector<8x128xbf16>
    %c1 = arith.constant 1 : index
    %c0_19 = arith.constant 0 : index
    %c0_20 = arith.constant 0 : index
    %19 = vector.load %arg2[%c1, %c0_19, %c0_20] : memref<5x128x128xbf16, #tpu.memory_space<vmem>>, vector<1x128x128xbf16>
    %20 = vector.shape_cast %19 : vector<1x128x128xbf16> to vector<128x128xbf16>
    %cst_21 = arith.constant dense<0.000000e+00> : vector<8x128xf32>
    %21 = tpu.matmul %18, %20, %cst_21 {dimension_numbers = #tpu.dot_dimension_numbers<[1], [0], [0], [1], [0, 0, 1, 1], [], []>} : vector<8x128xbf16>, vector<128x128xbf16>, vector<8x128xf32> -> vector<8x128xf32>
    %c1_22 = arith.constant 1 : index
    %c0_23 = arith.constant 0 : index
    %c0_24 = arith.constant 0 : index
    %22 = vector.load %arg3[%c1_22, %c0_23, %c0_24] : memref<5x1x128xf32, #tpu.memory_space<vmem>>, vector<1x1x128xf32>
    %23 = vector.shape_cast %22 : vector<1x1x128xf32> to vector<1x128xf32>
    %24 = vector.broadcast %23 : vector<1x128xf32> to vector<8x128xf32>
    %25 = arith.addf %21, %24 : vector<8x128xf32>
    %cst_25 = arith.constant 0.00999999977 : f32
    %26 = vector.broadcast %cst_25 : f32 to vector<8x128xf32>
    %27 = arith.mulf %26, %25 : vector<8x128xf32>
    %28 = arith.maximumf %25, %27 : vector<8x128xf32>
    %29 = arith.truncf %28 : vector<8x128xf32> to vector<8x128xbf16>
    %c0_26 = arith.constant 0 : index
    %c0_27 = arith.constant 0 : index
    %30 = vector.load %arg5[%c0_26, %c0_27] : memref<8x128xbf16, #tpu.memory_space<vmem>>, vector<8x128xbf16>
    tpu.vector_store %arg5[%c0_26, %c0_27], %29 {strides = array<i32>} : memref<8x128xbf16, #tpu.memory_space<vmem>>, vector<8x128xbf16>,
    %c0_28 = arith.constant 0 : index
    %c0_29 = arith.constant 0 : index
    %31 = vector.load %arg5[%c0_28, %c0_29] : memref<8x128xbf16, #tpu.memory_space<vmem>>, vector<8x128xbf16>
    %c2 = arith.constant 2 : index
    %c0_30 = arith.constant 0 : index
    %c0_31 = arith.constant 0 : index
    %32 = vector.load %arg2[%c2, %c0_30, %c0_31] : memref<5x128x128xbf16, #tpu.memory_space<vmem>>, vector<1x128x128xbf16>
    %33 = vector.shape_cast %32 : vector<1x128x128xbf16> to vector<128x128xbf16>
    %cst_32 = arith.constant dense<0.000000e+00> : vector<8x128xf32>
    %34 = tpu.matmul %31, %33, %cst_32 {dimension_numbers = #tpu.dot_dimension_numbers<[1], [0], [0], [1], [0, 0, 1, 1], [], []>} : vector<8x128xbf16>, vector<128x128xbf16>, vector<8x128xf32> -> vector<8x128xf32>
    %c2_33 = arith.constant 2 : index
    %c0_34 = arith.constant 0 : index
    %c0_35 = arith.constant 0 : index
    %35 = vector.load %arg3[%c2_33, %c0_34, %c0_35] : memref<5x1x128xf32, #tpu.memory_space<vmem>>, vector<1x1x128xf32>
    %36 = vector.shape_cast %35 : vector<1x1x128xf32> to vector<1x128xf32>
    %37 = vector.broadcast %36 : vector<1x128xf32> to vector<8x128xf32>
    %38 = arith.addf %34, %37 : vector<8x128xf32>
    %cst_36 = arith.constant 0.00999999977 : f32
    %39 = vector.broadcast %cst_36 : f32 to vector<8x128xf32>
    %40 = arith.mulf %39, %38 : vector<8x128xf32>
    %41 = arith.maximumf %38, %40 : vector<8x128xf32>
    %42 = arith.truncf %41 : vector<8x128xf32> to vector<8x128xbf16>
    %c0_37 = arith.constant 0 : index
    %c0_38 = arith.constant 0 : index
    %43 = vector.load %arg5[%c0_37, %c0_38] : memref<8x128xbf16, #tpu.memory_space<vmem>>, vector<8x128xbf16>
    tpu.vector_store %arg5[%c0_37, %c0_38], %42 {strides = array<i32>} : memref<8x128xbf16, #tpu.memory_space<vmem>>, vector<8x128xbf16>,
    %c0_39 = arith.constant 0 : index
    %c0_40 = arith.constant 0 : index
    %44 = vector.load %arg5[%c0_39, %c0_40] : memref<8x128xbf16, #tpu.memory_space<vmem>>, vector<8x128xbf16>
    %c3 = arith.constant 3 : index
    %c0_41 = arith.constant 0 : index
    %c0_42 = arith.constant 0 : index
    %45 = vector.load %arg2[%c3, %c0_41, %c0_42] : memref<5x128x128xbf16, #tpu.memory_space<vmem>>, vector<1x128x128xbf16>
    %46 = vector.shape_cast %45 : vector<1x128x128xbf16> to vector<128x128xbf16>
    %cst_43 = arith.constant dense<0.000000e+00> : vector<8x128xf32>
    %47 = tpu.matmul %44, %46, %cst_43 {dimension_numbers = #tpu.dot_dimension_numbers<[1], [0], [0], [1], [0, 0, 1, 1], [], []>} : vector<8x128xbf16>, vector<128x128xbf16>, vector<8x128xf32> -> vector<8x128xf32>
    %c3_44 = arith.constant 3 : index
    %c0_45 = arith.constant 0 : index
    %c0_46 = arith.constant 0 : index
    %48 = vector.load %arg3[%c3_44, %c0_45, %c0_46] : memref<5x1x128xf32, #tpu.memory_space<vmem>>, vector<1x1x128xf32>
    %49 = vector.shape_cast %48 : vector<1x1x128xf32> to vector<1x128xf32>
    %50 = vector.broadcast %49 : vector<1x128xf32> to vector<8x128xf32>
    %51 = arith.addf %47, %50 : vector<8x128xf32>
    %cst_47 = arith.constant 0.00999999977 : f32
    %52 = vector.broadcast %cst_47 : f32 to vector<8x128xf32>
    %53 = arith.mulf %52, %51 : vector<8x128xf32>
    %54 = arith.maximumf %51, %53 : vector<8x128xf32>
    %55 = arith.truncf %54 : vector<8x128xf32> to vector<8x128xbf16>
    %c0_48 = arith.constant 0 : index
    %c0_49 = arith.constant 0 : index
    %56 = vector.load %arg5[%c0_48, %c0_49] : memref<8x128xbf16, #tpu.memory_space<vmem>>, vector<8x128xbf16>
    tpu.vector_store %arg5[%c0_48, %c0_49], %55 {strides = array<i32>} : memref<8x128xbf16, #tpu.memory_space<vmem>>, vector<8x128xbf16>,
    %c0_50 = arith.constant 0 : index
    %c0_51 = arith.constant 0 : index
    %57 = vector.load %arg5[%c0_50, %c0_51] : memref<8x128xbf16, #tpu.memory_space<vmem>>, vector<8x128xbf16>
    %c4 = arith.constant 4 : index
    %c0_52 = arith.constant 0 : index
    %c0_53 = arith.constant 0 : index
    %58 = vector.load %arg2[%c4, %c0_52, %c0_53] : memref<5x128x128xbf16, #tpu.memory_space<vmem>>, vector<1x128x128xbf16>
    %59 = vector.shape_cast %58 : vector<1x128x128xbf16> to vector<128x128xbf16>
    %cst_54 = arith.constant dense<0.000000e+00> : vector<8x128xf32>
    %60 = tpu.matmul %57, %59, %cst_54 {dimension_numbers = #tpu.dot_dimension_numbers<[1], [0], [0], [1], [0, 0, 1, 1], [], []>} : vector<8x128xbf16>, vector<128x128xbf16>, vector<8x128xf32> -> vector<8x128xf32>
    %c4_55 = arith.constant 4 : index
    %c0_56 = arith.constant 0 : index
    %c0_57 = arith.constant 0 : index
    %61 = vector.load %arg3[%c4_55, %c0_56, %c0_57] : memref<5x1x128xf32, #tpu.memory_space<vmem>>, vector<1x1x128xf32>
    %62 = vector.shape_cast %61 : vector<1x1x128xf32> to vector<1x128xf32>
    %63 = vector.broadcast %62 : vector<1x128xf32> to vector<8x128xf32>
    %64 = arith.addf %60, %63 : vector<8x128xf32>
    %c0_58 = arith.constant 0 : index
    %c0_59 = arith.constant 0 : index
    %65 = vector.load %arg4[%c0_58, %c0_59] : memref<8x128xf32, #tpu.memory_space<vmem>>, vector<8x128xf32>
    tpu.vector_store %arg4[%c0_58, %c0_59], %64 {strides = array<i32>} : memref<8x128xf32, #tpu.memory_space<vmem>>, vector<8x128xf32>,
    return
  }
  func.func @transform_0(%arg0: i32) -> (i32, i32) {
    %c0_i32 = arith.constant 0 : i32
    %c0_i32_0 = arith.constant 0 : i32
    return %arg0, %c0_i32 : i32, i32
  }
  func.func @transform_1(%arg0: i32) -> (i32, i32, i32) {
    %c0_i32 = arith.constant 0 : i32
    %c0_i32_0 = arith.constant 0 : i32
    %c0_i32_1 = arith.constant 0 : i32
    %c0_i32_2 = arith.constant 0 : i32
    return %c0_i32, %c0_i32_0, %c0_i32_1 : i32, i32, i32
  }
  func.func @transform_2(%arg0: i32) -> (i32, i32, i32) {
    %c0_i32 = arith.constant 0 : i32
    %c0_i32_0 = arith.constant 0 : i32
    %c0_i32_1 = arith.constant 0 : i32
    %c0_i32_2 = arith.constant 0 : i32
    return %c0_i32, %c0_i32_0, %c0_i32_1 : i32, i32, i32
  }
  func.func @transform_3(%arg0: i32) -> (i32, i32) {
    %c0_i32 = arith.constant 0 : i32
    %c0_i32_0 = arith.constant 0 : i32
    return %arg0, %c0_i32 : i32, i32
  }
}

</mosaic_0001>

<bundles_post_ra>
// kernel: hidden_layers_forward.1
= control target key start
LH: loop header
LB: loop body
LE: loop exit
PB: predicated region body
PF: predicated region fallthrough
CT: control target
= control target key end

     0   :  { %8 = vsyncpa [#allocation4], 0  ;;  %s1098_s0 = inlined_call_operand.hbm [shape: f32[8,32], index: 0, kind: input, shape index: {}]   ;;  %s1099_s1 = inlined_call_operand.hbm [shape: bf16[5,128,128], index: 1, kind: input, shape index: {}]   ;;  %s1100_s2 = inlined_call_operand.vmem [shape: f32[5,1,128], index: 2, kind: input, shape index: {}]   ;;  %s1101_s3 = inlined_call_operand.hbm [shape: f32[8,128], index: 3, kind: output, shape index: {}]  }
   0x1   :  { %9 = vsyncpa [#allocation7], 0 }
   0x2   :  { %10 = vsyncpa [#allocation5], 0  ;;  %s962_s12 = smov [#allocation3]   ;;  %s963_s14 = smov [#allocation6]  }
   0x3   :  { %s17_s13 = sshll.u32 %s962_s12, 4  ;;  %s26_s15 = sshll.u32 %s963_s14, 4  ;;  %s18_s13 = int_to_ptr.vmem [resolvable:$true] %s17_s13  ;;  %s990_s15 = int_to_ptr.vmem [resolvable:$true] %s26_s15 }
   0x4   :  { %s890_s18 = scalar_lea.hbm %s1098_s0, 128 }
   0x5   :  { %p891_p0 = scmp.ne.s32.totalorder %s1098_s0, %s890_s18  ;;  %p894_p1 = scmp.lt.u32.totalorder %s890_s18, %s1098_s0 }
   0x7   :  { %p896_p2 = pnand %p894_p1, %p891_p0 }
   0x9   :  { %899 = shalt.err (!%p896_p2)
}
   0xa   :  { %s900_s23 = scalar_lea.vmem %s18_s13, 128  ;;  %p905_p4 = scmp.lt.s32.totalorder %s18_s13, %s18_s13 }
   0xb   :  { %p901_p3 = scmp.ne.s32.totalorder %s18_s13, %s900_s23  ;;  %p906_p5 = scmp.lt.s32.totalorder %s900_s23, %s900_s23 }
   0xd   :  { %p907_p6 = por %p906_p5, %p905_p4 }
   0xf   :  { %p908_p7 = pnand %p907_p6, %p901_p3 }
  0x11   :  { %911 = shalt.err (!%p908_p7)
}
  0x12   :  { %20 = dma.hbm_to_vmem [thread:$0]  %s1098_s0, 128, %s18_s13, [#allocation4]  }
  0x13   :  { %s912_s28 = scalar_lea.hbm %s1099_s1, 5120 }
  0x14   :  { %p913_p8 = scmp.ne.s32.totalorder %s1099_s1, %s912_s28  ;;  %p916_p9 = scmp.lt.u32.totalorder %s912_s28, %s1099_s1 }
  0x16   :  { %p918_p10 = pnand %p916_p9, %p913_p8 }
  0x18   :  { %921 = shalt.err (!%p918_p10)
}
  0x19   :  { %s922_s6 = scalar_lea.vmem %s990_s15, 5120  ;;  %p927_p12 = scmp.lt.s32.totalorder %s990_s15, %s990_s15 }
  0x1a   :  { %p923_p11 = scmp.ne.s32.totalorder %s990_s15, %s922_s6  ;;  %p928_p13 = scmp.lt.s32.totalorder %s922_s6, %s922_s6 }
  0x1c   :  { %p929_p0 = por %p928_p13, %p927_p12 }
  0x1e   :  { %p930_p1 = pnand %p929_p0, %p923_p11 }
  0x20   :  { %933 = shalt.err (!%p930_p1)
}
  0x21   :  { %s964_s0 = smov 64   ;;  %s965_s7 = smov 4  }
  0x22   :  { %32 = dma.hbm_to_vmem [thread:$0]  %s1099_s1, 5120, %s990_s15, [#allocation7], %s964_s0, %s964_s0, %s965_s7  }
  0x23   :  { %956 = dma.done.wait [#allocation4], 128  }
  0x24   :  { %957 = vsyncadd [#allocation4], 4294967168 }
  0x25   :  { %958 = dma.done.wait [#allocation7], 5120  }
  0x26   :  { %959 = vsyncadd [#allocation7], 4294962176  ;;  %v966_v0 = vmov 0.0   ;;  %vm967_vm0 = vmmov 0   ;;  %v968_v1 = vmov 0   ;;  %v850_v2 = vld [vmem:[#allocation6] sm:$0xff]  }
  0x27   :  { %742 = vmatprep.subr.bf16.mxu0 %v966_v0  ;;  %758 = vmatprep.mubr.msk.bf16.mxu0 %vm967_vm0, %v966_v0  ;;  %44 = vst [vmem:[#allocation2] sm:$0xf] %v968_v1  ;;  %v851_v3 = vld [vmem:[#allocation6 + $0x8] sm:$0xff]   ;;  %v852_v4 = vld [vmem:[#allocation6 + $0x10] sm:$0xff]   ;;  %v42_v5 = vld [vmem:[#allocation3] sm:$0xff]  ;;  %vm45_vm1 = vcmask 257024  }
  0x28   :  { %762 = vmatprep.subr.bf16.mxu1 %v966_v0  ;;  %778 = vmatprep.mubr.msk.bf16.mxu1 %vm967_vm0, %v966_v0  ;;  %v43_v6 = vpack.c.bf16 %v42_v5, %v42_v5  ;;  %v858_v7 = vld [vmem:[#allocation6 + $0x40] sm:$0xff]   ;;  %v853_v8 = vld [vmem:[#allocation6 + $0x18] sm:$0xff]   ;;  %v859_v9 = vld [vmem:[#allocation6 + $0x48] sm:$0xff]   ;;  %s969_s19 = smov [#allocation8]  }
  0x29   :  { %743 = vmatpush3.bf16.msra.mxu0 %v850_v2  ;;  %763 = vmatpush3.bf16.msra.mxu1 %v858_v7  ;;  %v854_v10 = vld [vmem:[#allocation6 + $0x20] sm:$0xff]   ;;  %v860_v11 = vld [vmem:[#allocation6 + $0x50] sm:$0xff]   ;;  %v855_v12 = vld [vmem:[#allocation6 + $0x28] sm:$0xff]   ;;  %s638_s20 = sshll.u32 %s969_s19, 4  ;;  %s639_s20 = int_to_ptr.vmem [resolvable:$true] %s638_s20 }
  0x2a   :  { %744 = vmatprep.subr.bf16.mxu0 %v966_v0  ;;  %46 = vst.msk [vmem:[#allocation2] sm:$0xf] %vm45_vm1, %v43_v6  ;;  %764 = vmatprep.subr.bf16.mxu1 %v966_v0  ;;  %v861_v13 = vld [vmem:[#allocation6 + $0x58] sm:$0xff]   ;;  %v856_v14 = vld [vmem:[#allocation6 + $0x30] sm:$0xff]   ;;  %v862_v17 = vld [vmem:[#allocation6 + $0x60] sm:$0xff]   ;;  %s934_s21 = scalar_lea.vmem %s639_s20, 128  ;;  %p939_p3 = scmp.lt.s32.totalorder %s639_s20, %s639_s20 }
  0x2b   :  { %v857_v15 = vld [vmem:[#allocation6 + $0x38] sm:$0xff]   ;;  %v863_v18 = vld [vmem:[#allocation6 + $0x68] sm:$0xff]   ;;  %v864_v19 = vld [vmem:[#allocation6 + $0x70] sm:$0xff]   ;;  %p935_p2 = scmp.ne.s32.totalorder %s639_s20, %s934_s21  ;;  %p940_p4 = scmp.lt.s32.totalorder %s934_s21, %s934_s21 }
  0x2c   :  { %v865_v20 = vld [vmem:[#allocation6 + $0x78] sm:$0xff]   ;;  %v866_v21 = vld [vmem:[#allocation6 + $0x80] sm:$0xff]   ;;  %v867_v22 = vld [vmem:[#allocation6 + $0x88] sm:$0xff]  }
  0x2d   :  { %745 = vmatpush3.bf16.msra.mxu0 %v851_v3  ;;  %765 = vmatpush3.bf16.msra.mxu1 %v859_v9  ;;  %v868_v23 = vld [vmem:[#allocation6 + $0x90] sm:$0xff]   ;;  %v869_v24 = vld [vmem:[#allocation6 + $0x98] sm:$0xff]   ;;  %v870_v35 = vld [vmem:[#allocation6 + $0xa0] sm:$0xff]   ;;  %p941_p5 = por %p940_p4, %p939_p3 }
  0x2e   :  { %746 = vmatprep.subr.bf16.mxu0 %v966_v0  ;;  %766 = vmatprep.subr.bf16.mxu1 %v966_v0  ;;  %v648_v25 = vld [vmem:[%s1100_s2] ss:$0 sm:$0xff]  ;;  %v871_v36 = vld [vmem:[#allocation6 + $0xa8] sm:$0xff]   ;;  %v873_v38 = vld [vmem:[#allocation6 + $0xb8] sm:$0xff]  }
  0x2f   :  { %v872_v37 = vld [vmem:[#allocation6 + $0xb0] sm:$0xff]   ;;  %v874_v39 = vld [vmem:[#allocation6 + $0xc0] sm:$0xff]   ;;  %v875_v40 = vld [vmem:[#allocation6 + $0xc8] sm:$0xff]   ;;  %p942_p6 = pnand %p941_p5, %p935_p2 }
  0x30   :  { %v876_v41 = vld [vmem:[#allocation6 + $0xd0] sm:$0xff]   ;;  %v877_v42 = vld [vmem:[#allocation6 + $0xd8] sm:$0xff]   ;;  %v878_v53 = vld [vmem:[#allocation6 + $0xe0] sm:$0xff]  }
  0x31   :  { %747 = vmatpush3.bf16.msra.mxu0 %v852_v4  ;;  %767 = vmatpush3.bf16.msra.mxu1 %v860_v11  ;;  %v47_v16 = vld [vmem:[#allocation2] sm:$0xf]  ;;  %v879_v54 = vld [vmem:[#allocation6 + $0xe8] sm:$0xff]   ;;  %v881_v56 = vld [vmem:[#allocation6 + $0xf8] sm:$0xff]  }
  0x32   :  { %748 = vmatprep.subr.bf16.mxu0 %v966_v0  ;;  %768 = vmatprep.subr.bf16.mxu1 %v966_v0  ;;  %v658_v43 = vld [vmem:[%s1100_s2 + $0x1] ss:$0 sm:$0xff]  ;;  %v882_v57 = vld [vmem:[#allocation6 + $0x100] sm:$0xff]   ;;  %v883_v58 = vld [vmem:[#allocation6 + $0x108] sm:$0xff]  }
  0x33   :  { %v880_v55 = vld [vmem:[#allocation6 + $0xf0] sm:$0xff]   ;;  %v885_v60 = vld [vmem:[#allocation6 + $0x118] sm:$0xff]   ;;  %v887_v9 = vld [vmem:[#allocation6 + $0x128] sm:$0xff]  }
  0x34   :  { %v884_v59 = vld [vmem:[#allocation6 + $0x110] sm:$0xff]   ;;  %v889_v11 = vld [vmem:[#allocation6 + $0x138] sm:$0xff]  }
  0x35   :  { %749 = vmatpush3.bf16.msra.mxu0 %v853_v8  ;;  %769 = vmatpush3.bf16.msra.mxu1 %v861_v13  ;;  %v668_v61 = vld [vmem:[%s1100_s2 + $0x2] ss:$0 sm:$0xff]  ;;  %v886_v8 = vld [vmem:[#allocation6 + $0x120] sm:$0xff]  }
  0x36   :  { %750 = vmatprep.subr.bf16.mxu0 %v966_v0  ;;  %770 = vmatprep.subr.bf16.mxu1 %v966_v0 }
  0x39   :  { %751 = vmatpush3.bf16.msra.mxu0 %v854_v10  ;;  %771 = vmatpush3.bf16.msra.mxu1 %v862_v17  ;;  %v888_v10 = vld [vmem:[#allocation6 + $0x130] sm:$0xff]  }
  0x3a   :  { %752 = vmatprep.subr.bf16.mxu0 %v966_v0  ;;  %772 = vmatprep.subr.bf16.mxu1 %v966_v0 }
  0x3d   :  { %753 = vmatpush3.bf16.msra.mxu0 %v855_v12  ;;  %773 = vmatpush3.bf16.msra.mxu1 %v863_v18  ;;  %v678_v12 = vld [vmem:[%s1100_s2 + $0x3] ss:$0 sm:$0xff] }
  0x3e   :  { %754 = vmatprep.subr.bf16.mxu0 %v966_v0  ;;  %774 = vmatprep.subr.bf16.mxu1 %v966_v0 }
  0x41   :  { %755 = vmatpush3.bf16.msra.mxu0 %v856_v14  ;;  %775 = vmatpush3.bf16.msra.mxu1 %v864_v19 }
  0x42   :  { %756 = vmatprep.subr.bf16.mxu0 %v966_v0  ;;  %776 = vmatprep.subr.bf16.mxu1 %v966_v0 }
  0x45   :  { %757 = vmatpush3.bf16.msra.mxu0 %v857_v15  ;;  %777 = vmatpush3.bf16.msra.mxu1 %v865_v20 }
  0x46   :  { %782 = vmatprep.subr.bf16.mxu0 %v966_v0  ;;  %802 = vmatprep.subr.bf16.mxu1 %v966_v0 }
  0x48   :  { %759 = vmatmul.mubr.bf16.vlgmr.msra.gmra.mrb[0].mxu0 %v47_v16 }
  0x49   :  { %798 = vmatprep.mubr.msk.bf16.mxu0 %vm967_vm0, %v966_v0  ;;  %783 = vmatpush3.bf16.msra.mxu0 %v866_v21 }
  0x4a   :  { %784 = vmatprep.subr.bf16.mxu0 %v966_v0 }
  0x4d   :  { %785 = vmatpush3.bf16.msra.mxu0 %v867_v22 }
  0x4e   :  { %786 = vmatprep.subr.bf16.mxu0 %v966_v0 }
  0x51   :  { %787 = vmatpush3.bf16.msra.mxu0 %v868_v23 }
  0x52   :  { %788 = vmatprep.subr.bf16.mxu0 %v966_v0 }
  0x55   :  { %789 = vmatpush3.bf16.msra.mxu0 %v869_v24 }
  0x56   :  { %790 = vmatprep.subr.bf16.mxu0 %v966_v0 }
  0x59   :  { %791 = vmatpush3.bf16.msra.mxu0 %v870_v35 }
  0x5a   :  { %792 = vmatprep.subr.bf16.mxu0 %v966_v0 }
  0x5d   :  { %793 = vmatpush3.bf16.msra.mxu0 %v871_v36 }
  0x5e   :  { %794 = vmatprep.subr.bf16.mxu0 %v966_v0 }
  0x61   :  { %795 = vmatpush3.bf16.msra.mxu0 %v872_v37 }
  0x62   :  { %796 = vmatprep.subr.bf16.mxu0 %v966_v0 }
  0x65   :  { %797 = vmatpush3.bf16.msra.mxu0 %v873_v38 }
  0x66   :  { %822 = vmatprep.subr.bf16.mxu0 %v966_v0 }
 0x11b   :  { %v153_v26 = vpop.f32.mrb[0].mxu0 }
 0x11c   :  { %v154_v27 = vadd.f32 %v648_v25, %v153_v26  ;;  %v760_v28 = vpop.f32.mrb[1].mxu0 }
 0x11d   :  { %v156_v29 = vpop.f32.mrb[2].mxu0 }
 0x11e   :  { %v159_v30 = vmul.f32 0.01, %v154_v27  ;;  %v761_v31 = vpop.f32.mrb[3].mxu0 }
 0x120   :  { %v160_v32 = vmax.f32 %v154_v27, %v159_v30 }
 0x122   :  { %v161_v33 = vpack.c.bf16 %v160_v32, %v160_v32 }
 0x124   :  { %162 = vst [vmem:[#allocation2] sm:$0xf] %v161_v33 }
 0x12b   :  { %v163_v34 = vld [vmem:[#allocation2] sm:$0xf] }
 0x12c   :  { %779 = vmatmul.mubr.bf16.vlgmr.msra.gmra.mrb[0].mxu1 %v163_v34 }
 0x12d   :  { %818 = vmatprep.mubr.msk.bf16.mxu1 %vm967_vm0, %v966_v0  ;;  %803 = vmatpush3.bf16.msra.mxu1 %v874_v39 }
 0x12e   :  { %804 = vmatprep.subr.bf16.mxu1 %v966_v0 }
 0x131   :  { %805 = vmatpush3.bf16.msra.mxu1 %v875_v40 }
 0x132   :  { %806 = vmatprep.subr.bf16.mxu1 %v966_v0 }
 0x135   :  { %807 = vmatpush3.bf16.msra.mxu1 %v876_v41 }
 0x136   :  { %808 = vmatprep.subr.bf16.mxu1 %v966_v0 }
 0x139   :  { %809 = vmatpush3.bf16.msra.mxu1 %v877_v42 }
 0x13a   :  { %810 = vmatprep.subr.bf16.mxu1 %v966_v0 }
 0x13d   :  { %811 = vmatpush3.bf16.msra.mxu1 %v878_v53 }
 0x13e   :  { %812 = vmatprep.subr.bf16.mxu1 %v966_v0 }
 0x141   :  { %813 = vmatpush3.bf16.msra.mxu1 %v879_v54 }
 0x142   :  { %814 = vmatprep.subr.bf16.mxu1 %v966_v0 }
 0x145   :  { %815 = vmatpush3.bf16.msra.mxu1 %v880_v55 }
 0x146   :  { %816 = vmatprep.subr.bf16.mxu1 %v966_v0 }
 0x149   :  { %817 = vmatpush3.bf16.msra.mxu1 %v881_v56 }
 0x1ff   :  { %v271_v44 = vpop.f32.mrb[0].mxu1 }
 0x200   :  { %v272_v45 = vadd.f32 %v658_v43, %v271_v44  ;;  %v780_v46 = vpop.f32.mrb[1].mxu1 }
 0x201   :  { %v274_v47 = vpop.f32.mrb[2].mxu1 }
 0x202   :  { %v277_v48 = vmul.f32 0.01, %v272_v45  ;;  %v781_v49 = vpop.f32.mrb[3].mxu1 }
 0x204   :  { %v278_v50 = vmax.f32 %v272_v45, %v277_v48 }
 0x206   :  { %v279_v51 = vpack.c.bf16 %v278_v50, %v278_v50 }
 0x208   :  { %280 = vst [vmem:[#allocation2] sm:$0xf] %v279_v51 }
 0x20f   :  { %v281_v52 = vld [vmem:[#allocation2] sm:$0xf] }
 0x210   :  { %799 = vmatmul.mubr.bf16.vlgmr.msra.gmra.mrb[4].mxu0 %v281_v52 }
 0x211   :  { %838 = vmatprep.mubr.msk.bf16.mxu0 %vm967_vm0, %v966_v0  ;;  %823 = vmatpush3.bf16.msra.mxu0 %v882_v57 }
 0x212   :  { %824 = vmatprep.subr.bf16.mxu0 %v966_v0 }
 0x215   :  { %825 = vmatpush3.bf16.msra.mxu0 %v883_v58 }
 0x216   :  { %826 = vmatprep.subr.bf16.mxu0 %v966_v0 }
 0x219   :  { %827 = vmatpush3.bf16.msra.mxu0 %v884_v59 }
 0x21a   :  { %828 = vmatprep.subr.bf16.mxu0 %v966_v0 }
 0x21d   :  { %829 = vmatpush3.bf16.msra.mxu0 %v885_v60 }
 0x21e   :  { %830 = vmatprep.subr.bf16.mxu0 %v966_v0 }
 0x221   :  { %831 = vmatpush3.bf16.msra.mxu0 %v886_v8 }
 0x222   :  { %832 = vmatprep.subr.bf16.mxu0 %v966_v0 }
 0x225   :  { %833 = vmatpush3.bf16.msra.mxu0 %v887_v9 }
 0x226   :  { %834 = vmatprep.subr.bf16.mxu0 %v966_v0 }
 0x229   :  { %835 = vmatpush3.bf16.msra.mxu0 %v888_v10 }
 0x22a   :  { %836 = vmatprep.subr.bf16.mxu0 %v966_v0  ;;  %v688_v0 = vld [vmem:[%s1100_s2 + $0x4] ss:$0 sm:$0xff] }
 0x22d   :  { %837 = vmatpush3.bf16.msra.mxu0 %v889_v11 }
 0x2e3   :  { %v389_v62 = vpop.f32.mrb[4].mxu0 }
 0x2e4   :  { %v390_v63 = vadd.f32 %v668_v61, %v389_v62  ;;  %v800_v1 = vpop.f32.mrb[5].mxu0 }
 0x2e5   :  { %v392_v2 = vpop.f32.mrb[6].mxu0 }
 0x2e6   :  { %v395_v3 = vmul.f32 0.01, %v390_v63  ;;  %v801_v4 = vpop.f32.mrb[7].mxu0 }
 0x2e8   :  { %v396_v5 = vmax.f32 %v390_v63, %v395_v3 }
 0x2ea   :  { %v397_v6 = vpack.c.bf16 %v396_v5, %v396_v5 }
 0x2ec   :  { %398 = vst [vmem:[#allocation2] sm:$0xf] %v397_v6 }
 0x2f3   :  { %v399_v7 = vld [vmem:[#allocation2] sm:$0xf] }
 0x2f4   :  { %819 = vmatmul.mubr.bf16.vlgmr.msra.gmra.mrb[4].mxu1 %v399_v7 }
 0x3c7   :  { %v507_v13 = vpop.f32.mrb[4].mxu1 }
 0x3c8   :  { %v508_v14 = vadd.f32 %v678_v12, %v507_v13  ;;  %v820_v15 = vpop.f32.mrb[5].mxu1 }
 0x3c9   :  { %v510_v16 = vpop.f32.mrb[6].mxu1 }
 0x3ca   :  { %v513_v17 = vmul.f32 0.01, %v508_v14  ;;  %v821_v18 = vpop.f32.mrb[7].mxu1 }
 0x3cc   :  { %v514_v19 = vmax.f32 %v508_v14, %v513_v17 }
 0x3ce   :  { %v515_v20 = vpack.c.bf16 %v514_v19, %v514_v19 }
 0x3d0   :  { %516 = vst [vmem:[#allocation2] sm:$0xf] %v515_v20 }
 0x3d7   :  { %v517_v21 = vld [vmem:[#allocation2] sm:$0xf] }
 0x3d8   :  { %839 = vmatmul.mubr.bf16.vlgmr.msra.gmra.mrb[8].mxu0 %v517_v21 }
 0x4ab   :  { %v625_v22 = vpop.f32.mrb[8].mxu0 }
 0x4ac   :  { %v626_v23 = vadd.f32 %v688_v0, %v625_v22  ;;  %v840_v24 = vpop.f32.mrb[9].mxu0 }
 0x4ad   :  { %v628_v25 = vpop.f32.mrb[10].mxu0 }
 0x4ae   :  { %631 = vst [vmem:[#allocation8] sm:$0xff] %v626_v23  ;;  %v841_v26 = vpop.f32.mrb[11].mxu0 }
 0x4af   :  { %945 = shalt.err (!%p942_p6)
}
 0x4b0   :  { %s946_s2 = scalar_lea.hbm %s1101_s3, 128 }
 0x4b1   :  { %p947_p7 = scmp.ne.s32.totalorder %s1101_s3, %s946_s2  ;;  %p950_p8 = scmp.lt.u32.totalorder %s946_s2, %s1101_s3 }
 0x4b3   :  { %p952_p9 = pnand %p950_p8, %p947_p7 }
 0x4b5   :  { %955 = shalt.err (!%p952_p9)
}
 0x4b6   :  { %641 = dma.vmem_to_hbm [thread:$0]  %s639_s20, 128, %s1101_s3, [#allocation5]  }
 0x4b7   :  { %960 = dma.done.wait [#allocation5], 128  }
 0x4b8   :  { %961 = vsyncadd [#allocation5], 4294967168 }
 0x4b9   :  { %645 = vsyncpa [#allocation4], 1 }
 0x4ba   :  { %646 = vsyncpa [#allocation7], 1 }
 0x4bb   :  { %647 = vsyncpa [#allocation5], 1 }

</bundles_post_ra>
